<compile_context>
chip_gen: v6e
topology: v6e:2x2x1
jax: 0.10.0
libtpu: 0.0.40
codegen_flags: <defaults>
</compile_context>

<pallas_src>
import jax
import jax.numpy as jnp
from jax.experimental import pallas as pl
from jax.experimental.pallas import tpu as pltpu


def densenet_kernel(
    x_ref,                                   # (2, TB)   x^T tile
    w1_ref, b1_ref,                          # (H, 2), (H, 1)
    w2h_ref, w2x_ref, b2_ref,                # (H, H), (H, 2), (H, 1)
    w3h2_ref, w3h1_ref, w3x_ref, b3_ref,     # (H, 1), (H, 1), (1, 2), (1, 1)
    out_ref,                                 # (1, TB)
):
    x0 = x_ref[0:1, :]                       # (1, TB)
    x1 = x_ref[1:2, :]                       # (1, TB)

    # layer1: Linear(2, H) + tanh.  K=2 contraction -> VPU broadcast FMAs.
    w1 = w1_ref[...]
    h1 = jnp.tanh(w1[:, 0:1] * x0 + w1[:, 1:2] * x1 + b1_ref[...])        # (H, TB)

    # layer2: Linear(H+2, H) on cat(h1, x) + tanh
    #   == W2h @ h1^T (MXU) + W2x @ x^T (VPU FMAs) + b2
    w2x = w2x_ref[...]
    h2 = jnp.tanh(
        jnp.dot(w2h_ref[...], h1, preferred_element_type=jnp.float32)
        + w2x[:, 0:1] * x0 + w2x[:, 1:2] * x1
        + b2_ref[...]
    )                                                                      # (H, TB)

    # layer3: Linear(2H+2, 1) on cat(h2, h1, x) + sigmoid.
    # N=1 projection -> lane-dense multiply + sublane reduction (no MXU push).
    w3x = w3x_ref[...]
    logits = (
        jnp.sum(w3h2_ref[...] * h2, axis=0, keepdims=True)                 # (1, TB)
        + jnp.sum(w3h1_ref[...] * h1, axis=0, keepdims=True)
        + w3x[0:1, 0:1] * x0 + w3x[0:1, 1:2] * x1
        + b3_ref[...]
    )
    out_ref[...] = jax.nn.sigmoid(logits)


def _round_up(n, m):
    return ((n + m - 1) // m) * m


def densenet_forward(x, params, *, block_batch=2048):
    """x: (B, 2) float32. Returns (B, 1) float32."""
    B = x.shape[0]
    H = params["w1"].shape[0]

    # Batch tile: multiple of 128 lanes (256-friendly by default), bounded so
    # VMEM stays tiny even with double buffering; pad batch to a tile multiple.
    tb = min(block_batch, _round_up(B, 128))
    b_pad = _round_up(B, tb)
    n_blocks = b_pad // tb

    xt = jnp.zeros((2, b_pad), jnp.float32).at[:, :B].set(x.T)

    def resident(shape):
        # Weight / bias blocks: full array, constant index_map -> stay in VMEM.
        return pl.BlockSpec(shape, lambda i: (0, 0))

    out_t = pl.pallas_call(
        densenet_kernel,
        out_shape=jax.ShapeDtypeStruct((1, b_pad), jnp.float32),
        grid=(n_blocks,),
        in_specs=[
            pl.BlockSpec((2, tb), lambda i: (0, i)),       # x^T tile
            resident((H, 2)), resident((H, 1)),            # w1, b1
            resident((H, H)), resident((H, 2)), resident((H, 1)),   # w2h, w2x, b2
            resident((H, 1)), resident((H, 1)), resident((1, 2)), resident((1, 1)),
        ],
        out_specs=pl.BlockSpec((1, tb), lambda i: (0, i)),
        compiler_params=pltpu.CompilerParams(
            dimension_semantics=("parallel",),
        ),
    )(
        xt,
        params["w1"], params["b1"],
        params["w2h"], params["w2x"], params["b2"],
        params["w3h2"], params["w3h1"], params["w3x"], params["b3"],
    )
    return out_t[:, :B].T                                  # (B, 1)


def init_params(key, num_hid):
    """Deterministic init mirroring nn.Linear (weights stored [out, in])."""
    ks = jax.random.split(key, 6)
    H = num_hid

    def uniform(k, shape, fan_in):
        bound = 1.0 / jnp.sqrt(jnp.float32(fan_in))
        return jax.random.uniform(k, shape, jnp.float32, -bound, bound)

    w1 = uniform(ks[0], (H, 2), 2)                 # layer1.weight
    b1 = uniform(ks[1], (H, 1), 2)                 # layer1.bias (column)
    w2 = uniform(ks[2], (H, H + 2), H + 2)         # layer2.weight
    b2 = uniform(ks[3], (H, 1), H + 2)
    w3 = uniform(ks[4], (1, 2 * H + 2), 2 * H + 2)  # layer3.weight
    b3 = uniform(ks[5], (1, 1), 2 * H + 2)

    return {
        "w1": w1, "b1": b1,
        "w2h": w2[:, :H], "w2x": w2[:, H:], "b2": b2,
        "w3h2": w3[:, :H].T, "w3h1": w3[:, H:2 * H].T, "w3x": w3[:, 2 * H:], "b3": b3,
    }


def densenet_ref(x, p):
    """Pure-JAX reference mirroring the PyTorch forward (cat == split matmuls)."""
    h1 = jnp.tanh(x @ p["w1"].T + p["b1"].T)
    h2 = jnp.tanh(h1 @ p["w2h"].T + x @ p["w2x"].T + p["b2"].T)
    logits = h2 @ p["w3h2"] + h1 @ p["w3h1"] + x @ p["w3x"].T + p["b3"]
    return jax.nn.sigmoid(logits)


if __name__ == "__main__":
    key = jax.random.PRNGKey(0)
    k_params, k_x1, k_x2 = jax.random.split(key, 3)

    num_hid = 32
    params = init_params(k_params, num_hid)

    # Case 1: batch that exercises a multi-step grid (1024 rows, TB=512 -> 2 steps).
    batch = 1024
    x = jax.random.normal(k_x1, (batch, 2), jnp.float32)
    out = jax.block_until_ready(densenet_forward(x, params, block_batch=512))
    ref = densenet_ref(x, params)
    assert out.shape == (batch, 1)
    assert jnp.allclose(out, ref, atol=1e-5, rtol=1e-5)

    # Case 2: ragged batch that exercises the padding path.
    batch2 = 300
    x2 = jax.random.normal(k_x2, (batch2, 2), jnp.float32)
    out2 = jax.block_until_ready(densenet_forward(x2, params, block_batch=512))
    ref2 = densenet_ref(x2, params)
    assert out2.shape == (batch2, 1)
    assert jnp.allclose(out2, ref2, atol=1e-5, rtol=1e-5)

    print("KERNEL_OK")
</pallas_src>

<mosaic_0001>
module attributes {stable_mosaic.version = 11 : i64} {
  func.func @densenet_kernel(%arg0: i32, %arg1: memref<2x512xf32, #tpu.memory_space<vmem>>, %arg2: memref<32x2xf32, #tpu.memory_space<vmem>>, %arg3: memref<32x1xf32, #tpu.memory_space<vmem>>, %arg4: memref<32x32xf32, #tpu.memory_space<vmem>>, %arg5: memref<32x2xf32, #tpu.memory_space<vmem>>, %arg6: memref<32x1xf32, #tpu.memory_space<vmem>>, %arg7: memref<32x1xf32, #tpu.memory_space<vmem>>, %arg8: memref<32x1xf32, #tpu.memory_space<vmem>>, %arg9: memref<1x2xf32, #tpu.memory_space<vmem>>, %arg10: memref<1x1xf32, #tpu.memory_space<vmem>>, %arg11: memref<1x512xf32, #tpu.memory_space<vmem>>) attributes {dimension_semantics = [#tpu.dimension_semantics<parallel>], iteration_bounds = array<i64: 2>, scalar_prefetch = 0 : i64, scratch_operands = 0 : i64, tpu.core_type = #tpu.core_type<tc>, window_params = [{transform_indices = @transform_0, window_bounds = array<i64: 2, 512>}, {pipeline_mode = #tpu.pipeline_mode<synchronous>, transform_indices = @transform_1, window_bounds = array<i64: 32, 2>}, {pipeline_mode = #tpu.pipeline_mode<synchronous>, transform_indices = @transform_2, window_bounds = array<i64: 32, 1>}, {pipeline_mode = #tpu.pipeline_mode<synchronous>, transform_indices = @transform_3, window_bounds = array<i64: 32, 32>}, {pipeline_mode = #tpu.pipeline_mode<synchronous>, transform_indices = @transform_4, window_bounds = array<i64: 32, 2>}, {pipeline_mode = #tpu.pipeline_mode<synchronous>, transform_indices = @transform_5, window_bounds = array<i64: 32, 1>}, {pipeline_mode = #tpu.pipeline_mode<synchronous>, transform_indices = @transform_6, window_bounds = array<i64: 32, 1>}, {pipeline_mode = #tpu.pipeline_mode<synchronous>, transform_indices = @transform_7, window_bounds = array<i64: 32, 1>}, {pipeline_mode = #tpu.pipeline_mode<synchronous>, transform_indices = @transform_8, window_bounds = array<i64: 1, 2>}, {pipeline_mode = #tpu.pipeline_mode<synchronous>, transform_indices = @transform_9, window_bounds = array<i64: 1, 1>}, {transform_indices = @transform_10, window_bounds = array<i64: 1, 512>}]} {
    %c0 = arith.constant 0 : index
    %c0_0 = arith.constant 0 : index
    %0 = vector.load %arg1[%c0, %c0_0] : memref<2x512xf32, #tpu.memory_space<vmem>>, vector<1x512xf32>
    %c1 = arith.constant 1 : index
    %c0_1 = arith.constant 0 : index
    %1 = vector.load %arg1[%c1, %c0_1] : memref<2x512xf32, #tpu.memory_space<vmem>>, vector<1x512xf32>
    %c0_2 = arith.constant 0 : index
    %c0_3 = arith.constant 0 : index
    %2 = vector.load %arg2[%c0_2, %c0_3] : memref<32x2xf32, #tpu.memory_space<vmem>>, vector<32x2xf32>
    %3 = vector.extract_strided_slice %2 {offsets = [0, 0], sizes = [32, 1], strides = [1, 1]} : vector<32x2xf32> to vector<32x1xf32>
    %4 = vector.broadcast %3 : vector<32x1xf32> to vector<32x512xf32>
    %5 = vector.broadcast %0 : vector<1x512xf32> to vector<32x512xf32>
    %6 = arith.mulf %4, %5 : vector<32x512xf32>
    %7 = vector.extract_strided_slice %2 {offsets = [0, 1], sizes = [32, 1], strides = [1, 1]} : vector<32x2xf32> to vector<32x1xf32>
    %8 = vector.broadcast %7 : vector<32x1xf32> to vector<32x512xf32>
    %9 = vector.broadcast %1 : vector<1x512xf32> to vector<32x512xf32>
    %10 = arith.mulf %8, %9 : vector<32x512xf32>
    %11 = arith.addf %6, %10 : vector<32x512xf32>
    %c0_4 = arith.constant 0 : index
    %c0_5 = arith.constant 0 : index
    %12 = vector.load %arg3[%c0_4, %c0_5] : memref<32x1xf32, #tpu.memory_space<vmem>>, vector<32x1xf32>
    %13 = vector.broadcast %12 : vector<32x1xf32> to vector<32x512xf32>
    %14 = arith.addf %11, %13 : vector<32x512xf32>
    %15 = math.tanh %14 : vector<32x512xf32>
    %c0_6 = arith.constant 0 : index
    %c0_7 = arith.constant 0 : index
    %16 = vector.load %arg5[%c0_6, %c0_7] : memref<32x2xf32, #tpu.memory_space<vmem>>, vector<32x2xf32>
    %c0_8 = arith.constant 0 : index
    %c0_9 = arith.constant 0 : index
    %17 = vector.load %arg4[%c0_8, %c0_9] : memref<32x32xf32, #tpu.memory_space<vmem>>, vector<32x32xf32>
    %cst = arith.constant dense<0.000000e+00> : vector<32x512xf32>
    %18 = tpu.matmul %17, %15, %cst {dimension_numbers = #tpu.dot_dimension_numbers<[1], [0], [0], [1], [0, 0, 1, 1], [], []>} : vector<32x32xf32>, vector<32x512xf32>, vector<32x512xf32> -> vector<32x512xf32>
    %19 = vector.extract_strided_slice %16 {offsets = [0, 0], sizes = [32, 1], strides = [1, 1]} : vector<32x2xf32> to vector<32x1xf32>
    %20 = vector.broadcast %19 : vector<32x1xf32> to vector<32x512xf32>
    %21 = vector.broadcast %0 : vector<1x512xf32> to vector<32x512xf32>
    %22 = arith.mulf %20, %21 : vector<32x512xf32>
    %23 = arith.addf %18, %22 : vector<32x512xf32>
    %24 = vector.extract_strided_slice %16 {offsets = [0, 1], sizes = [32, 1], strides = [1, 1]} : vector<32x2xf32> to vector<32x1xf32>
    %25 = vector.broadcast %24 : vector<32x1xf32> to vector<32x512xf32>
    %26 = vector.broadcast %1 : vector<1x512xf32> to vector<32x512xf32>
    %27 = arith.mulf %25, %26 : vector<32x512xf32>
    %28 = arith.addf %23, %27 : vector<32x512xf32>
    %c0_10 = arith.constant 0 : index
    %c0_11 = arith.constant 0 : index
    %29 = vector.load %arg6[%c0_10, %c0_11] : memref<32x1xf32, #tpu.memory_space<vmem>>, vector<32x1xf32>
    %30 = vector.broadcast %29 : vector<32x1xf32> to vector<32x512xf32>
    %31 = arith.addf %28, %30 : vector<32x512xf32>
    %32 = math.tanh %31 : vector<32x512xf32>
    %c0_12 = arith.constant 0 : index
    %c0_13 = arith.constant 0 : index
    %33 = vector.load %arg9[%c0_12, %c0_13] : memref<1x2xf32, #tpu.memory_space<vmem>>, vector<1x2xf32>
    %c0_14 = arith.constant 0 : index
    %c0_15 = arith.constant 0 : index
    %34 = vector.load %arg7[%c0_14, %c0_15] : memref<32x1xf32, #tpu.memory_space<vmem>>, vector<32x1xf32>
    %35 = vector.broadcast %34 : vector<32x1xf32> to vector<32x512xf32>
    %36 = arith.mulf %35, %32 : vector<32x512xf32>
    %cst_16 = arith.constant dense<0.000000e+00> : vector<512xf32>
    %37 = vector.multi_reduction <add>, %36, %cst_16 [0] : vector<32x512xf32> to vector<512xf32>
    %38 = vector.shape_cast %37 : vector<512xf32> to vector<1x512xf32>
    %c0_17 = arith.constant 0 : index
    %c0_18 = arith.constant 0 : index
    %39 = vector.load %arg8[%c0_17, %c0_18] : memref<32x1xf32, #tpu.memory_space<vmem>>, vector<32x1xf32>
    %40 = vector.broadcast %39 : vector<32x1xf32> to vector<32x512xf32>
    %41 = arith.mulf %40, %15 : vector<32x512xf32>
    %cst_19 = arith.constant dense<0.000000e+00> : vector<512xf32>
    %42 = vector.multi_reduction <add>, %41, %cst_19 [0] : vector<32x512xf32> to vector<512xf32>
    %43 = vector.shape_cast %42 : vector<512xf32> to vector<1x512xf32>
    %44 = arith.addf %38, %43 : vector<1x512xf32>
    %45 = vector.extract_strided_slice %33 {offsets = [0, 0], sizes = [1, 1], strides = [1, 1]} : vector<1x2xf32> to vector<1x1xf32>
    %46 = vector.broadcast %45 : vector<1x1xf32> to vector<1x512xf32>
    %47 = arith.mulf %46, %0 : vector<1x512xf32>
    %48 = arith.addf %44, %47 : vector<1x512xf32>
    %49 = vector.extract_strided_slice %33 {offsets = [0, 1], sizes = [1, 1], strides = [1, 1]} : vector<1x2xf32> to vector<1x1xf32>
    %50 = vector.broadcast %49 : vector<1x1xf32> to vector<1x512xf32>
    %51 = arith.mulf %50, %1 : vector<1x512xf32>
    %52 = arith.addf %48, %51 : vector<1x512xf32>
    %c0_20 = arith.constant 0 : index
    %c0_21 = arith.constant 0 : index
    %53 = vector.load %arg10[%c0_20, %c0_21] : memref<1x1xf32, #tpu.memory_space<vmem>>, vector<1x1xf32>
    %54 = vector.broadcast %53 : vector<1x1xf32> to vector<1x512xf32>
    %55 = arith.addf %52, %54 : vector<1x512xf32>
    %56 = arith.negf %55 : vector<1x512xf32>
    %57 = math.exp %56 : vector<1x512xf32>
    %cst_22 = arith.constant 1.000000e+00 : f32
    %58 = vector.broadcast %cst_22 : f32 to vector<1x512xf32>
    %59 = arith.addf %58, %57 : vector<1x512xf32>
    %60 = arith.divf %58, %59 : vector<1x512xf32>
    %c0_23 = arith.constant 0 : index
    %c0_24 = arith.constant 0 : index
    %61 = vector.load %arg11[%c0_23, %c0_24] : memref<1x512xf32, #tpu.memory_space<vmem>>, vector<1x512xf32>
    tpu.vector_store %arg11[%c0_23, %c0_24], %60 {strides = array<i32>} : memref<1x512xf32, #tpu.memory_space<vmem>>, vector<1x512xf32>,
    return
  }
  func.func @transform_0(%arg0: i32) -> (i32, i32) {
    %c0_i32 = arith.constant 0 : i32
    %c0_i32_0 = arith.constant 0 : i32
    return %c0_i32, %arg0 : i32, i32
  }
  func.func @transform_1(%arg0: i32) -> (i32, i32) {
    %c0_i32 = arith.constant 0 : i32
    %c0_i32_0 = arith.constant 0 : i32
    %c0_i32_1 = arith.constant 0 : i32
    return %c0_i32, %c0_i32_0 : i32, i32
  }
  func.func @transform_2(%arg0: i32) -> (i32, i32) {
    %c0_i32 = arith.constant 0 : i32
    %c0_i32_0 = arith.constant 0 : i32
    %c0_i32_1 = arith.constant 0 : i32
    return %c0_i32, %c0_i32_0 : i32, i32
  }
  func.func @transform_3(%arg0: i32) -> (i32, i32) {
    %c0_i32 = arith.constant 0 : i32
    %c0_i32_0 = arith.constant 0 : i32
    %c0_i32_1 = arith.constant 0 : i32
    return %c0_i32, %c0_i32_0 : i32, i32
  }
  func.func @transform_4(%arg0: i32) -> (i32, i32) {
    %c0_i32 = arith.constant 0 : i32
    %c0_i32_0 = arith.constant 0 : i32
    %c0_i32_1 = arith.constant 0 : i32
    return %c0_i32, %c0_i32_0 : i32, i32
  }
  func.func @transform_5(%arg0: i32) -> (i32, i32) {
    %c0_i32 = arith.constant 0 : i32
    %c0_i32_0 = arith.constant 0 : i32
    %c0_i32_1 = arith.constant 0 : i32
    return %c0_i32, %c0_i32_0 : i32, i32
  }
  func.func @transform_6(%arg0: i32) -> (i32, i32) {
    %c0_i32 = arith.constant 0 : i32
    %c0_i32_0 = arith.constant 0 : i32
    %c0_i32_1 = arith.constant 0 : i32
    return %c0_i32, %c0_i32_0 : i32, i32
  }
  func.func @transform_7(%arg0: i32) -> (i32, i32) {
    %c0_i32 = arith.constant 0 : i32
    %c0_i32_0 = arith.constant 0 : i32
    %c0_i32_1 = arith.constant 0 : i32
    return %c0_i32, %c0_i32_0 : i32, i32
  }
  func.func @transform_8(%arg0: i32) -> (i32, i32) {
    %c0_i32 = arith.constant 0 : i32
    %c0_i32_0 = arith.constant 0 : i32
    %c0_i32_1 = arith.constant 0 : i32
    return %c0_i32, %c0_i32_0 : i32, i32
  }
  func.func @transform_9(%arg0: i32) -> (i32, i32) {
    %c0_i32 = arith.constant 0 : i32
    %c0_i32_0 = arith.constant 0 : i32
    %c0_i32_1 = arith.constant 0 : i32
    return %c0_i32, %c0_i32_0 : i32, i32
  }
  func.func @transform_10(%arg0: i32) -> (i32, i32) {
    %c0_i32 = arith.constant 0 : i32
    %c0_i32_0 = arith.constant 0 : i32
    return %c0_i32, %arg0 : i32, i32
  }
}

</mosaic_0001>

<bundles_post_ra>
// kernel: tpu_custom_call.1
= control target key start
LH: loop header
LB: loop body
LE: loop exit
PB: predicated region body
PF: predicated region fallthrough
CT: control target
= control target key end

     0   :  { %s2026_s0 = inlined_call_operand.vmem [shape: f32[2,1024], index: 0, kind: input, shape index: {}]   ;;  %s2027_s1 = inlined_call_operand.vmem [shape: f32[32,2], index: 1, kind: input, shape index: {}]   ;;  %s2028_s2 = inlined_call_operand.vmem [shape: f32[32,1], index: 2, kind: input, shape index: {}]   ;;  %s2029_s3 = inlined_call_operand.vmem [shape: f32[32,32], index: 3, kind: input, shape index: {}]   ;;  %s2030_s4 = inlined_call_operand.vmem [shape: f32[32,2], index: 4, kind: input, shape index: {}]   ;;  %s2031_s5 = inlined_call_operand.vmem [shape: f32[32,1], index: 5, kind: input, shape index: {}]   ;;  %s2032_s6 = inlined_call_operand.vmem [shape: f32[32,1], index: 6, kind: input, shape index: {}]   ;;  %s2033_s7 = inlined_call_operand.vmem [shape: f32[32,1], index: 7, kind: input, shape index: {}]   ;;  %s2034_s8 = inlined_call_operand.vmem [shape: f32[1,2], index: 8, kind: input, shape index: {}]   ;;  %s2035_s9 = inlined_call_operand.<no memory space> [shape: f32[1,1], index: 9, kind: input, shape index: {}]   ;;  %s2036_s10 = inlined_call_operand.hbm [shape: f32[1,1024], index: 10, kind: output, shape index: {}]  }
   0x1   :  { %v15_v0 = vstv %s2035_s9 }
   0x2   :  { %16 = vst [vmem:[#allocation2] sm:$0x1] %v15_v0 }
   0x3   :  { %17 = vsyncpa [#allocation4], 0 }
   0x4   :  { %19 = vsyncpa [#allocation4 + $0x1], 0  ;;  %s1551_s15 = smov 0   ;;  %s1553_s16 = smov 0  }
   0x5   :  { %s1555_s17 = smov 0   ;;  %s1557_s18 = smov 0  }
   0x6 LB: > { %s1572_s9 = sadd.s32 4294967295, %s1486_s18   ;;  %s1263_s19 = sadd.s32 4294967294, %s1486_s18   ;;  %s1486_s18 = sphi %s1557_s18, %s2042_s18   ;;  %s1482_s17 = sphi %s1555_s17, %s2041_s17   ;;  %s1478_s16 = sphi %s1553_s16, %s2040_s16   ;;  %s1474_s15 = sphi %s1551_s15, %s2039_s15  }
   0x7   : > { %s1576_s20 = sadd.s32 1, %s1486_s18   ;;  %s247_s21 = sadd.s32 1, %s1482_s17 }
   0x8   : > { %s244_s22 = ssub.s32 %s1486_s18, %s1576_s20  ;;  %p257_p0 = scmp.ne.s32.totalorder %s1482_s17, %s1478_s16 }
   0x9   : > { %p245_p1 = scmp.eq.s32.totalorder %s244_s22, 0  ;;  %p258_p2 = scmp.eq.s32.totalorder %s1572_s9, 1 }
   0xa   : > { %p263_p3 = scmp.ne.s32.totalorder %s1478_s16, %s1474_s15  ;;  %p264_p4 = scmp.eq.s32.totalorder %s1263_s19, 1 }
   0xb   : > { %s1587_s23 = scalar_select %p245_p1, %s1482_s17, %s247_s21  }
   0xc   : > { %p1589_p5 = por %p258_p2, %p257_p0  ;;  %p1593_p6 = por %p264_p4, %p263_p3 }
   0xd   : > { %p1266_p7 = scmp.ge.s32.totalorder %s1486_s18, 1  ;;  %p318_p8 = scmp.lt.s32.totalorder %s1486_s18, 3 }
   0xf   : > { %p319_p9 = pnand %p1266_p7, %p318_p8 }
  0x10   : > { %s1268_s28 = sshll.u32 (!%p319_p9), %s1572_s9, 2  ;;  %s1288_s11 = sshll.u32 (!%p319_p9), %s1572_s9, 6 }
  0x11   : > { %322 = sbr.rel (%p319_p9) target bundleno = 501 (0x1f5), region = 60  ;;  %p357_p10 = scmp.lt.s32.totalorder (!%p319_p9), %s1268_s28, 7 }
  0x12   : > { %s1202_s21 = scalar_lea.hbm (!%p319_p9), %s2036_s10, %s1288_s11  ;;  %s1492_s27 = smov (!%p319_p9), [#allocation3]  }
  0x13   : > { %s1430_s9 = sshll.u32 (!%p319_p9), %s1492_s27, 4  ;;  %s1431_s9 = int_to_ptr.vmem [resolvable:$false] %s1430_s9 }
  0x16   : > { %v369_v1 = vld [vmem:[%s2027_s1 + $0x18] sm:$0xff]  ;;  %v368_v2 = vld [vmem:[%s2027_s1 + $0x10] sm:$0xff]  ;;  %v1488_v3 = vmov 1   ;;  %v1489_v4 = vmov 0   ;;  %v367_v5 = vld [vmem:[%s2027_s1 + $0x8] sm:$0xff]  ;;  %v1490_v18 = vmov 0.0   ;;  %v391_v30 = vlaneseq }
  0x17   : > { %1332 = vset.pattern.permute.xlu0 %v1488_v3  ;;  %1333 = vset.pattern.permute.xlu1 %v1489_v4  ;;  %v366_v6 = vld [vmem:[%s2027_s1] sm:$0xff]  ;;  %v499_v7 = vld [vmem:[%s2028_s2 + $0x18] sm:$0xff]  ;;  %v497_v8 = vld [vmem:[%s2028_s2 + $0x8] sm:$0xff]  ;;  %s2044_s28 = smov (!%p357_p10, %s1268_s28), 7  ;;  %vm596_vm0 = vcmask 261120  }
  0x18   : > { %440 = vperm.xlu0 %1332, %v369_v1   ;;  %382 = vperm.xlu1 %1333, %v368_v2   ;;  %v553_v9 = vld [vmem:[%s2030_s4 + $0x8] sm:$0xff]  ;;  %v498_v10 = vld [vmem:[%s2028_s2 + $0x10] sm:$0xff]  ;;  %v555_v11 = vld [vmem:[%s2030_s4 + $0x18] sm:$0xff]  ;;  %v1685_v31 = vshrl.u32 %v391_v30, 7  ;;  %s1269_s29 = sshll.u32 %s2044_s28, 1  ;;  %vm1186_vm1 = vcmp.lt.s32.totalorder %v391_v30, 512 }
  0x19   : > { %v496_v12 = vld [vmem:[%s2028_s2] sm:$0xff]  ;;  %v554_v14 = vld [vmem:[%s2030_s4 + $0x10] sm:$0xff]  ;;  %v836_v15 = vld [vmem:[%s2031_s5 + $0x8] sm:$0xff]  ;;  %673 = vmatprep.mubr.f32.mxu0 %v1490_v18  ;;  %762 = vmatprep.mubr.f32.mxu1 %v1490_v18  ;;  %s360_s12 = scalar_lea.vmem %s2026_s0, %s1269_s29  ;;  %s353_s29 = sand.u32 1, %s1478_s16  }
  0x1a   : > { %v552_v13 = vld [vmem:[%s2030_s4] sm:$0xff]  ;;  %v837_v20 = vld [vmem:[%s2031_s5 + $0x10] sm:$0xff]  ;;  %v838_v21 = vld [vmem:[%s2031_s5 + $0x18] sm:$0xff]  ;;  %v1691_v34 = vsub.s32 0, %v1685_v31  ;;  %v1694_v35 = vsub.s32 1, %v1685_v31  ;;  %v1697_v36 = vsub.s32 2, %v1685_v31 }
  0x1b   : > { %v892_v16 = vld [vmem:[%s2032_s6] sm:$0xff]  ;;  %v893_v22 = vld [vmem:[%s2032_s6 + $0x8] sm:$0xff]  ;;  %v970_v24 = vld [vmem:[%s2033_s7 + $0x10] sm:$0xff]  ;;  %v1700_v37 = vsub.s32 3, %v1685_v31  ;;  %s1267_s30 = sshll.u32 %s353_s29, 2  ;;  %s1190_s22 = scalar_lea.sflag [#allocation4], %s353_s29 }
  0x1c   : > { %1334 = vset.pattern.permute.xlu1 %v1488_v3  ;;  %432 = vperm.xlu0 %1332, %v367_v5   ;;  %v968_v17 = vld [vmem:[%s2033_s7] sm:$0xff]  ;;  %v969_v23 = vld [vmem:[%s2033_s7 + $0x8] sm:$0xff]  ;;  %v971_v25 = vld [vmem:[%s2033_s7 + $0x18] sm:$0xff]  ;;  %s1432_s28 = scalar_lea.vmem %s1431_s9, 128 }
  0x1d   : > { %436 = vperm.xlu1 %1334, %v368_v2   ;;  %v835_v19 = vld [vmem:[%s2031_s5] sm:$0xff]  ;;  %v894_v26 = vld [vmem:[%s2032_s6 + $0x10] sm:$0xff]  ;;  %v895_v28 = vld [vmem:[%s2032_s6 + $0x18] sm:$0xff] }
  0x1e   : > { %v891_v27 = vld [vmem:[%s2034_s8] sm:$0x1]  ;;  %v1702_v38 = vld [vmem:[%s360_s12 + $0x1] ss:$2 sm:$0xf] }
  0x1f   : > { %v1117_v29 = vld [vmem:[#allocation2] sm:$0x1]  ;;  %v1708_v42 = vrot.slane %v1702_v38, %v1691_v34  ;;  %v1712_v43 = vrot.slane %v1702_v38, %v1694_v35  ;;  %v1716_v44 = vrot.slane %v1702_v38, %v1697_v36  ;;  %v1720_v45 = vrot.slane %v1702_v38, %v1700_v37 }
  0x20   : > { %1336 = vset.pattern.permute.xlu0 %v1489_v4  ;;  %v1704_v39 = vld [vmem:[%s360_s12] ss:$2 sm:$0xf]  ;;  %s355_s12 = scalar_lea.vmem [#allocation3], %s1267_s30 }
  0x21   : > { %1335 = vset.pattern.permute.xlu1 %v1489_v4  ;;  %387 = vperm.xlu0 %1336, %v369_v1   ;;  %v1724_v46 = vrot.slane %v1704_v39, %v1691_v34  ;;  %v1728_v47 = vrot.slane %v1704_v39, %v1694_v35  ;;  %v1732_v48 = vrot.slane %v1704_v39, %v1697_v36  ;;  %s1204_s13 = sshll.u32 %s355_s12, 4  ;;  %s1205_s13 = int_to_ptr.vmem [resolvable:$true] %s1204_s13 }
  0x22   : > { %377 = vperm.xlu1 %1335, %v367_v5   ;;  %v1736_v49 = vrot.slane %v1704_v39, %v1700_v37  ;;  %s1426_s26 = scalar_lea.vmem %s1205_s13, 64  ;;  %p1433_p0 = scmp.lt.s32.totalorder %s1205_s13, %s1431_s9 }
  0x23   : > { %p1427_p11 = scmp.ne.s32.totalorder %s1205_s13, %s1426_s26  ;;  %p1434_p1 = scmp.lt.s32.totalorder %s1432_s28, %s1426_s26 }
  0x25   : > { %372 = vperm.xlu0 %1336, %v366_v6   ;;  %p1428_p12 = pnand %p1427_p11, %p1589_p5  ;;  %p1435_p2 = por %p1434_p1, %p1433_p0 }
  0x26   : > { %517 = vperm.xlu1 %1335, %v499_v7  }
  0x27   : > { %p1429_p13 = pneg %p1428_p12 }
  0x29   : > { %507 = vperm.xlu0 %1336, %v497_v8   ;;  %p1436_p3 = pnand %p1435_p2, %p1429_p13 }
  0x2a   : > { %1337 = vset.pattern.permute.xlu1 %v1488_v3 }
  0x2b   : > { %428 = vperm.xlu1 %1337, %v366_v6  }
  0x2d   : > { %1340 = vset.pattern.permute.xlu0 %v1488_v3 }
  0x2e   : > { %792 = vperm.xlu0 %1340, %v553_v9  }
  0x2f   : > { %1338 = vset.pattern.permute.xlu1 %v1489_v4 }
  0x30   : > { %512 = vperm.xlu1 %1338, %v498_v10  }
  0x32   : > { %800 = vperm.xlu0 %1340, %v555_v11  }
  0x34   : > { %502 = vperm.xlu1 %1338, %v496_v12  }
  0x36   : > { %1343 = vset.pattern.permute.xlu0 %v1489_v4 }
  0x37   : > { %562 = vperm.xlu0 %1343, %v552_v13  }
  0x38   : > { %567 = vperm.xlu1 %1338, %v553_v9  }
  0x3b   : > { %572 = vperm.xlu0 %1343, %v554_v14  }
  0x3c   : > { %1339 = vset.pattern.permute.xlu1 %v1488_v3 }
  0x3d   : > { %788 = vperm.xlu1 %1339, %v552_v13  }
  0x3f   : > { %846 = vperm.xlu0 %1343, %v836_v15  }
  0x41   : > { %1341 = vset.pattern.permute.xlu1 %v1489_v4 }
  0x42   : > { %577 = vperm.xlu1 %1341, %v555_v11  }
  0x43   : > { %898 = vperm.xlu0 %1343, %v892_v16  }
  0x46   : > { %1342 = vset.pattern.permute.xlu1 %v1488_v3 }
  0x47   : > { %796 = vperm.xlu1 %1342, %v554_v14   ;;  %974 = vperm.xlu0 %1343, %v968_v17  }
  0x4b   : > { %1344 = vset.pattern.permute.xlu1 %v1489_v4  ;;  %908 = vperm.xlu0 %1343, %v894_v26  }
  0x4c   : > { %841 = vperm.xlu1 %1344, %v835_v19  }
  0x4f   : > { %913 = vperm.xlu0 %1343, %v895_v28  }
  0x50   : > { %851 = vperm.xlu1 %1344, %v837_v20  }
  0x53   : > { %1050 = vperm.xlu0 %1343, %v891_v27  }
  0x54   : > { %856 = vperm.xlu1 %1344, %v838_v21  }
  0x57   : > { %1120 = vperm.xlu0 %1343, %v1117_v29  }
  0x58   : > { %903 = vperm.xlu1 %1344, %v893_v22  }
  0x5c   : > { %979 = vperm.xlu1 %1344, %v969_v23  }
  0x60   : > { %984 = vperm.xlu1 %1344, %v970_v24  }
  0x64   : > { %989 = vperm.xlu1 %1344, %v971_v25  }
  0x68   : > { %1345 = vset.pattern.permute.xlu1 %v1488_v3 }
  0x69   : > { %1084 = vperm.xlu1 %1345, %v891_v27  }
  0x93   : > { %v383_v32 = vpop.permute.xlu1 %382  ;;  %v441_v33 = vpop.permute.xlu0 %440 }
  0x94   : > { %v476_v50 = vmul.f32 %v1708_v42, %v441_v33  ;;  %v477_v51 = vmul.f32 %v1712_v43, %v441_v33  ;;  %v478_v52 = vmul.f32 %v1716_v44, %v441_v33  ;;  %v479_v53 = vmul.f32 %v1720_v45, %v441_v33 }
  0x95   : > { %v419_v3 = vmul.f32 %v1724_v46, %v383_v32  ;;  %v420_v21 = vmul.f32 %v1728_v47, %v383_v32  ;;  %v421_v22 = vmul.f32 %v1732_v48, %v383_v32  ;;  %v422_v24 = vmul.f32 %v1736_v49, %v383_v32 }
  0x97   : > { %v433_v40 = vpop.permute.xlu0 %432 }
  0x98   : > { %v437_v41 = vpop.permute.xlu1 %436  ;;  %v468_v0 = vmul.f32 %v1708_v42, %v433_v40  ;;  %v469_v4 = vmul.f32 %v1712_v43, %v433_v40  ;;  %v470_v5 = vmul.f32 %v1716_v44, %v433_v40  ;;  %v471_v13 = vmul.f32 %v1720_v45, %v433_v40 }
  0x99   : > { %v472_v12 = vmul.f32 %v1708_v42, %v437_v41  ;;  %v473_v16 = vmul.f32 %v1712_v43, %v437_v41  ;;  %v474_v17 = vmul.f32 %v1716_v44, %v437_v41  ;;  %v475_v28 = vmul.f32 %v1720_v45, %v437_v41 }
  0x9c   : > { %v388_v54 = vpop.permute.xlu0 %387 }
  0x9d   : > { %v423_v55 = vmul.f32 %v1724_v46, %v388_v54  ;;  %v424_v56 = vmul.f32 %v1728_v47, %v388_v54  ;;  %v425_v57 = vmul.f32 %v1732_v48, %v388_v54  ;;  %v426_v58 = vmul.f32 %v1736_v49, %v388_v54  ;;  %v378_v59 = vpop.permute.xlu1 %377 }
  0x9e   : > { %v415_v1 = vmul.f32 %v1724_v46, %v378_v59  ;;  %v416_v6 = vmul.f32 %v1728_v47, %v378_v59  ;;  %v417_v8 = vmul.f32 %v1732_v48, %v378_v59  ;;  %v418_v14 = vmul.f32 %v1736_v49, %v378_v59 }
  0x9f   : > { %v492_v60 = vadd.f32 %v476_v50, %v423_v55  ;;  %v493_v61 = vadd.f32 %v477_v51, %v424_v56  ;;  %v494_v62 = vadd.f32 %v478_v52, %v425_v57  ;;  %v495_v63 = vadd.f32 %v479_v53, %v426_v58 }
  0xa0   : > { %v373_v2 = vpop.permute.xlu0 %372  ;;  %v484_v20 = vadd.f32 %v468_v0, %v415_v1  ;;  %v485_v23 = vadd.f32 %v469_v4, %v416_v6  ;;  %v486_v25 = vadd.f32 %v470_v5, %v417_v8  ;;  %v487_v29 = vadd.f32 %v471_v13, %v418_v14 }
  0xa1   : > { %v518_v7 = vpop.permute.xlu1 %517  ;;  %v488_v50 = vadd.f32 %v472_v12, %v419_v3  ;;  %v489_v51 = vadd.f32 %v473_v16, %v420_v21  ;;  %v490_v52 = vadd.f32 %v474_v17, %v421_v22  ;;  %v411_v53 = vmul.f32 %v1724_v46, %v373_v2 }
  0xa2   : > { %v532_v9 = vadd.f32 %v518_v7, %v492_v60  ;;  %v533_v10 = vadd.f32 %v518_v7, %v493_v61  ;;  %v534_v11 = vadd.f32 %v518_v7, %v494_v62  ;;  %v535_v15 = vadd.f32 %v518_v7, %v495_v63 }
  0xa3   : > { %v412_v54 = vmul.f32 %v1728_v47, %v373_v2  ;;  %v413_v55 = vmul.f32 %v1732_v48, %v373_v2  ;;  %v414_v58 = vmul.f32 %v1736_v49, %v373_v2  ;;  %v491_v61 = vadd.f32 %v475_v28, %v422_v24 }
  0xa4   : > { %1346 = vtanh.f32 %v532_v9  ;;  %v508_v19 = vpop.permute.xlu0 %507 }
  0xa5   : > { %1348 = vtanh.f32 %v533_v10  ;;  %v524_v26 = vadd.f32 %v508_v19, %v484_v20  ;;  %v525_v33 = vadd.f32 %v508_v19, %v485_v23  ;;  %v526_v40 = vadd.f32 %v508_v19, %v486_v25 }
  0xa6   : > { %1350 = vtanh.f32 %v534_v11  ;;  %v429_v27 = vpop.permute.xlu1 %428  ;;  %v527_v32 = vadd.f32 %v508_v19, %v487_v29 }
  0xa7   : > { %1352 = vtanh.f32 %v535_v15  ;;  %v464_v56 = vmul.f32 %v1708_v42, %v429_v27  ;;  %v465_v57 = vmul.f32 %v1712_v43, %v429_v27  ;;  %v466_v41 = vmul.f32 %v1716_v44, %v429_v27 }
  0xa8   : > { %1354 = vtanh.f32 %v524_v26  ;;  %v467_v59 = vmul.f32 %v1720_v45, %v429_v27 }
  0xa9   : > { %1356 = vtanh.f32 %v525_v33  ;;  %v480_v3 = vadd.f32 %v464_v56, %v411_v53  ;;  %v481_v4 = vadd.f32 %v465_v57, %v412_v54  ;;  %v482_v5 = vadd.f32 %v466_v41, %v413_v55  ;;  %v1770_v8 = vpop.permute.xlu0 %792  ;;  %v557_v55 = vld [vmem:[%s2029_s3 + $0x8] sm:$0xff]  ;;  %v558_v57 = vld [vmem:[%s2029_s3 + $0x10] sm:$0xff] }
  0xaa   : > { %1358 = vtanh.f32 %v526_v40  ;;  %v483_v7 = vadd.f32 %v467_v59, %v414_v58  ;;  %v559_v58 = vld [vmem:[%s2029_s3 + $0x18] sm:$0xff] }
  0xab   : > { %v513_v60 = vpop.permute.xlu1 %512  ;;  %1360 = vtanh.f32 %v527_v32 }
  0xac   : > { %v528_v62 = vadd.f32 %v513_v60, %v488_v50  ;;  %v529_v63 = vadd.f32 %v513_v60, %v489_v51  ;;  %v530_v0 = vadd.f32 %v513_v60, %v490_v52  ;;  %v531_v1 = vadd.f32 %v513_v60, %v491_v61  ;;  %v556_v51 = vld [vmem:[%s2029_s3] sm:$0xff] }
  0xad   : > { %v1785_v17 = vpop.permute.xlu0 %800 }
  0xae   : > { %1362 = vtanh.f32 %v528_v62 }
  0xaf   : > { %1364 = vtanh.f32 %v529_v63  ;;  %v503_v6 = vpop.permute.xlu1 %502 }
  0xb0   : > { %1366 = vtanh.f32 %v530_v0  ;;  %v520_v2 = vadd.f32 %v503_v6, %v480_v3  ;;  %v521_v9 = vadd.f32 %v503_v6, %v481_v4  ;;  %v522_v10 = vadd.f32 %v503_v6, %v482_v5 }
  0xb1   : > { %v1772_v11 = vpop.eup %1346  ;;  %1368 = vtanh.f32 %v531_v1  ;;  %v523_v12 = vadd.f32 %v503_v6, %v483_v7 }
  0xb2   : > { %v1774_v13 = vpop.eup %1348  ;;  %1370 = vtanh.f32 %v520_v2  ;;  %v1794_v26 = vpop.permute.xlu0 %562 }
  0xb3   : > { %v1776_v14 = vpop.eup %1350  ;;  %1372 = vtanh.f32 %v521_v9  ;;  %633 = vmatprep.subr.mxu0 %v1774_v13  ;;  %v1781_v16 = vpop.permute.xlu1 %567 }
  0xb4   : > { %v1779_v15 = vpop.eup %1352  ;;  %1374 = vtanh.f32 %v522_v10  ;;  %634 = vmatpush1.msra.mxu0 %v1772_v11 }
  0xb5   : > { %1376 = vtanh.f32 %v523_v12  ;;  %722 = vmatprep.subr.mxu1 %v1779_v15  ;;  %v1355_v19 = vpop.eup %1354 }
  0xb6   : > { %723 = vmatpush1.msra.mxu1 %v1776_v14  ;;  %v1357_v20 = vpop.eup %1356  ;;  %v1806_v53 = vpop.permute.xlu0 %572 }
  0xb7   : > { %v1359_v22 = vpop.eup %1358 }
  0xb8   : > { %v1788_v21 = vpop.permute.xlu1 %788  ;;  %v1361_v23 = vpop.eup %1360 }
  0xba   : > { %v1819_v56 = vpop.permute.xlu0 %846 }
  0xbb   : > { %v1790_v24 = vpop.eup %1362 }
  0xbc   : > { %v1792_v25 = vpop.eup %1364 }
  0xbd   : > { %v1796_v27 = vpop.eup %1366  ;;  %635 = vmatprep.subr.mxu0 %v1792_v25  ;;  %v1799_v28 = vpop.permute.xlu1 %577 }
  0xbe   : > { %v1369_v29 = vpop.eup %1368  ;;  %636 = vmatpush1.msra.mxu0 %v1790_v24  ;;  %v1836_v59 = vpop.permute.xlu0 %898 }
  0xbf   : > { %v1371_v33 = vpop.eup %1370  ;;  %724 = vmatprep.subr.mxu1 %v1369_v29  ;;  %637 = vmatprep.subr.mxu0 %v1357_v20 }
  0xc0   : > { %v1373_v40 = vpop.eup %1372  ;;  %725 = vmatpush1.msra.mxu1 %v1796_v27  ;;  %638 = vmatpush1.msra.mxu0 %v1355_v19 }
  0xc1   : > { %v1375_v50 = vpop.eup %1374  ;;  %726 = vmatprep.subr.mxu1 %v1361_v23  ;;  %639 = vmatprep.subr.mxu0 %v1373_v40 }
  0xc2   : > { %v1377_v52 = vpop.eup %1376  ;;  %727 = vmatpush1.msra.mxu1 %v1359_v22  ;;  %640 = vmatpush1.msra.mxu0 %v1371_v33  ;;  %v1808_v54 = vpop.permute.xlu1 %796 }
  0xc3   : > { %728 = vmatprep.subr.mxu1 %v1377_v52  ;;  %1271 = vmatmul.mubr.msk.f32.vlgmr.msra.gmra.mxu0 %vm596_vm0, %v556_v51  ;;  %v975_v62 = vpop.permute.xlu0 %974 }
  0xc4   : > { %729 = vmatpush1.msra.mxu1 %v1375_v50  ;;  %679 = vmatprep.mubr.f32.mxu0 %v1490_v18  ;;  %v992_v63 = vmul.f32 %v1371_v33, %v975_v62  ;;  %v993_v0 = vmul.f32 %v1373_v40, %v975_v62  ;;  %v994_v1 = vmul.f32 %v1375_v50, %v975_v62 }
  0xc5   : > { %1275 = vmatmul.mubr.msk.f32.vlgmr.msra.gmra.mxu1 %vm596_vm0, %v556_v51  ;;  %v995_v3 = vmul.f32 %v1377_v52, %v975_v62 }
  0xc6   : > { %768 = vmatprep.mubr.f32.mxu1 %v1490_v18 }
  0xc7   : > { %v1817_v32 = vpop.permute.xlu1 %841  ;;  %1272 = vmatmul.mubr.msk.f32.gmra.mxu0 %vm596_vm0, %v557_v55 }
  0xc8   : > { %685 = vmatprep.mubr.f32.mxu0 %v1490_v18 }
  0xc9   : > { %1276 = vmatmul.mubr.msk.f32.gmra.mxu1 %vm596_vm0, %v557_v55 }
  0xca   : > { %774 = vmatprep.mubr.f32.mxu1 %v1490_v18 }
  0xcb   : > { %v1828_v41 = vpop.permute.xlu1 %851  ;;  %1273 = vmatmul.mubr.msk.f32.gmra.mxu0 %vm596_vm0, %v558_v57 }
  0xcc   : > { %691 = vmatprep.mubr.f32.mxu0 %v1490_v18 }
  0xcd   : > { %1277 = vmatmul.mubr.msk.f32.gmra.mxu1 %vm596_vm0, %v558_v57 }
  0xce   : > { %780 = vmatprep.mubr.f32.mxu1 %v1490_v18 }
  0xcf   : > { %v1839_v60 = vpop.permute.xlu1 %856  ;;  %1274 = vmatmul.mubr.msk.f32.gmra.mxu0 %vm596_vm0, %v559_v58 }
  0xd1   : > { %1278 = vmatmul.mubr.msk.f32.gmra.mxu1 %vm596_vm0, %v559_v58 }
  0xd3   : > { %v1843_v61 = vpop.permute.xlu1 %903 }
  0xd7   : > { %v980_v4 = vpop.permute.xlu1 %979 }
  0xd8   : > { %v996_v5 = vmul.f32 %v1355_v19, %v980_v4  ;;  %v997_v6 = vmul.f32 %v1357_v20, %v980_v4  ;;  %v998_v7 = vmul.f32 %v1359_v22, %v980_v4  ;;  %v999_v2 = vmul.f32 %v1361_v23, %v980_v4 }
  0xd9   : > { %v587_v4 = vmul.f32 %v1781_v16, %v1736_v49 }
  0xda   : > { %v1008_v9 = vadd.f32 %v996_v5, %v992_v63  ;;  %v1017_v18 = vadd.f32 %v997_v6, %v993_v0  ;;  %v1026_v10 = vadd.f32 %v998_v7, %v994_v1  ;;  %v1035_v12 = vadd.f32 %v999_v2, %v995_v3 }
  0xdb   : > { %v985_v51 = vpop.permute.xlu1 %984  ;;  %v805_v1 = vmul.f32 %v1788_v21, %v1716_v44  ;;  %v804_v3 = vmul.f32 %v1788_v21, %v1712_v43  ;;  %v582_v5 = vmul.f32 %v1794_v26, %v1732_v48  ;;  %v806_v6 = vmul.f32 %v1788_v21, %v1720_v45 }
  0xdc   : > { %v1000_v55 = vmul.f32 %v1790_v24, %v985_v51  ;;  %v1001_v57 = vmul.f32 %v1792_v25, %v985_v51  ;;  %v1002_v58 = vmul.f32 %v1796_v27, %v985_v51  ;;  %v1003_v33 = vmul.f32 %v1369_v29, %v985_v51 }
  0xdd   : > { %v580_v29 = vmul.f32 %v1794_v26, %v1724_v46  ;;  %v807_v7 = vmul.f32 %v1770_v8, %v1708_v42  ;;  %v809_v2 = vmul.f32 %v1770_v8, %v1716_v44  ;;  %v1898_v51 = vmul.f32 %v1785_v17, %v1716_v44 }
  0xde   : > { %v1009_v40 = vadd.f32 %v1008_v9, %v1000_v55  ;;  %v1018_v50 = vadd.f32 %v1017_v18, %v1001_v57  ;;  %v1027_v52 = vadd.f32 %v1026_v10, %v1002_v58  ;;  %v1036_v62 = vadd.f32 %v1035_v12, %v1003_v33 }
  0xdf   : > { %v990_v19 = vpop.permute.xlu1 %989  ;;  %v581_v9 = vmul.f32 %v1794_v26, %v1728_v47  ;;  %v808_v18 = vmul.f32 %v1770_v8, %v1712_v43  ;;  %v1892_v10 = vmul.f32 %v1785_v17, %v1708_v42  ;;  %v583_v12 = vmul.f32 %v1794_v26, %v1736_v49 }
  0xe0   : > { %v1004_v20 = vmul.f32 %v1772_v11, %v990_v19  ;;  %v1005_v22 = vmul.f32 %v1774_v13, %v990_v19  ;;  %v1006_v23 = vmul.f32 %v1776_v14, %v990_v19  ;;  %v1007_v63 = vmul.f32 %v1779_v15, %v990_v19 }
  0xe1   : > { %v584_v11 = vmul.f32 %v1781_v16, %v1724_v46  ;;  %v586_v13 = vmul.f32 %v1781_v16, %v1732_v48  ;;  %v585_v14 = vmul.f32 %v1781_v16, %v1728_v47  ;;  %v803_v15 = vmul.f32 %v1788_v21, %v1708_v42 }
  0xe2   : > { %v1852_v0 = vadd.f32 %v1009_v40, %v1004_v20  ;;  %v1854_v24 = vadd.f32 %v1018_v50, %v1005_v22  ;;  %v1856_v25 = vadd.f32 %v1027_v52, %v1006_v23  ;;  %v1858_v27 = vadd.f32 %v1036_v62, %v1007_v63 }
  0xe3   : > { %v810_v16 = vmul.f32 %v1770_v8, %v1720_v45  ;;  %v1902_v55 = vmul.f32 %v1785_v17, %v1712_v43  ;;  %v1906_v57 = vmul.f32 %v1785_v17, %v1720_v45  ;;  %v592_v33 = vmul.f32 %v1799_v28, %v1724_v46 }
  0xe4   : > { %v1912_v26 = vmul.f32 %v1799_v28, %v1732_v48  ;;  %v1916_v40 = vmul.f32 %v1799_v28, %v1728_v47  ;;  %v811_v62 = vmul.f32 %v1808_v54, %v1708_v42  ;;  %v813_v17 = vmul.f32 %v1808_v54, %v1716_v44 }
  0xe5   : > { %v1924_v19 = vmul.f32 %v1799_v28, %v1736_v49  ;;  %v812_v63 = vmul.f32 %v1808_v54, %v1712_v43  ;;  %v588_v42 = vmul.f32 %v1806_v53, %v1724_v46  ;;  %v590_v44 = vmul.f32 %v1806_v53, %v1732_v48 }
  0xe6   : > { %v589_v43 = vmul.f32 %v1806_v53, %v1728_v47 }
 0x183   : > { %v675_v21 = vpop.f32.mrf.mxu0 }
 0x184   : > { %v676_v8 = vadd.f32 %v675_v21, %v580_v29  ;;  %v814_v29 = vmul.f32 %v1808_v54, %v1720_v45 }
 0x185   : > { %v764_v58 = vpop.f32.mrf.mxu1  ;;  %v677_v52 = vpop.f32.mrf.mxu0 }
 0x186   : > { %v765_v50 = vadd.f32 %v764_v58, %v582_v5  ;;  %v819_v20 = vadd.f32 %v803_v15, %v676_v8  ;;  %v678_v22 = vadd.f32 %v677_v52, %v581_v9 }
 0x187   : > { %v766_v23 = vpop.f32.mrf.mxu1  ;;  %v681_v58 = vpop.f32.mrf.mxu0 }
 0x188   : > { %v821_v5 = vadd.f32 %v805_v1, %v765_v50  ;;  %v767_v21 = vadd.f32 %v766_v23, %v583_v12  ;;  %v859_v28 = vadd.f32 %v1817_v32, %v819_v20  ;;  %v820_v15 = vadd.f32 %v804_v3, %v678_v22 }
 0x189   : > { %v682_v9 = vadd.f32 %v681_v58, %v584_v11  ;;  %v770_v8 = vpop.f32.mrf.mxu1  ;;  %v683_v1 = vpop.f32.mrf.mxu0  ;;  %v591_v12 = vmul.f32 %v1806_v53, %v1736_v49 }
 0x18a   : > { %v861_v52 = vadd.f32 %v1817_v32, %v821_v5  ;;  %v822_v45 = vadd.f32 %v806_v6, %v767_v21  ;;  %v771_v54 = vadd.f32 %v770_v8, %v586_v13  ;;  %1378 = vtanh.f32 %v859_v28 }
 0x18b   : > { %v860_v46 = vadd.f32 %v1817_v32, %v820_v15  ;;  %v823_v48 = vadd.f32 %v807_v7, %v682_v9  ;;  %v684_v50 = vadd.f32 %v683_v1, %v585_v14  ;;  %v772_v20 = vpop.f32.mrf.mxu1  ;;  %v687_v47 = vpop.f32.mrf.mxu0 }
 0x18c   : > { %1380 = vtanh.f32 %v861_v52  ;;  %v862_v11 = vadd.f32 %v1817_v32, %v822_v45  ;;  %v825_v3 = vadd.f32 %v809_v2, %v771_v54  ;;  %v773_v22 = vadd.f32 %v772_v20, %v587_v4 }
 0x18d   : > { %1382 = vtanh.f32 %v860_v46  ;;  %v863_v6 = vadd.f32 %v1819_v56, %v823_v48  ;;  %v824_v13 = vadd.f32 %v808_v18, %v684_v50  ;;  %v688_v23 = vadd.f32 %v687_v47, %v588_v42  ;;  %v776_v5 = vpop.f32.mrf.mxu1  ;;  %v689_v7 = vpop.f32.mrf.mxu0 }
 0x18e   : > { %1384 = vtanh.f32 %v862_v11  ;;  %v865_v49 = vadd.f32 %v1819_v56, %v825_v3  ;;  %v826_v53 = vadd.f32 %v810_v16, %v773_v22  ;;  %v777_v21 = vadd.f32 %v776_v5, %v590_v44 }
 0x18f   : > { %1386 = vtanh.f32 %v863_v6  ;;  %v864_v14 = vadd.f32 %v1819_v56, %v824_v13  ;;  %v827_v58 = vadd.f32 %v811_v62, %v688_v23  ;;  %v690_v32 = vadd.f32 %v689_v7, %v589_v43  ;;  %v778_v2 = vpop.f32.mrf.mxu1  ;;  %v693_v18 = vpop.f32.mrf.mxu0 }
 0x190   : > { %1388 = vtanh.f32 %v865_v49  ;;  %v866_v4 = vadd.f32 %v1819_v56, %v826_v53  ;;  %v829_v28 = vadd.f32 %v813_v17, %v777_v21  ;;  %v779_v15 = vadd.f32 %v778_v2, %v591_v12 }
 0x191   : > { %1390 = vtanh.f32 %v864_v14  ;;  %v867_v42 = vadd.f32 %v1828_v41, %v827_v58  ;;  %v828_v9 = vadd.f32 %v812_v63, %v690_v32  ;;  %v694_v8 = vadd.f32 %v693_v18, %v592_v33  ;;  %v782_v16 = vpop.f32.mrf.mxu1  ;;  %v695_v43 = vpop.f32.mrf.mxu0 }
 0x192   : > { %1392 = vtanh.f32 %v866_v4  ;;  %v869_v44 = vadd.f32 %v1828_v41, %v829_v28  ;;  %v830_v52 = vadd.f32 %v814_v29, %v779_v15  ;;  %v783_v62 = vadd.f32 %v782_v16, %v1912_v26 }
 0x193   : > { %1394 = vtanh.f32 %v867_v42  ;;  %v868_v45 = vadd.f32 %v1828_v41, %v828_v9  ;;  %v831_v56 = vadd.f32 %v1892_v10, %v694_v8  ;;  %v696_v17 = vadd.f32 %v695_v43, %v1916_v40  ;;  %v784_v54 = vpop.f32.mrf.mxu1 }
 0x194   : > { %1396 = vtanh.f32 %v869_v44  ;;  %v870_v63 = vadd.f32 %v1828_v41, %v830_v52  ;;  %v833_v33 = vadd.f32 %v1898_v51, %v783_v62  ;;  %v785_v1 = vadd.f32 %v784_v54, %v1924_v19 }
 0x195   : > { %1398 = vtanh.f32 %v868_v45  ;;  %v871_v29 = vadd.f32 %v1839_v60, %v831_v56  ;;  %v832_v26 = vadd.f32 %v1902_v55, %v696_v17  ;;  %v1011_v55 = vrot.slane %v1852_v0, 4 }
 0x196   : > { %1400 = vtanh.f32 %v870_v63  ;;  %v873_v12 = vadd.f32 %v1839_v60, %v833_v33  ;;  %v834_v10 = vadd.f32 %v1906_v57, %v785_v1  ;;  %v1020_v3 = vrot.slane %v1854_v24, 4  ;;  %v909_v57 = vpop.permute.xlu0 %908 }
 0x197   : > { %1402 = vtanh.f32 %v871_v29  ;;  %v872_v40 = vadd.f32 %v1839_v60, %v832_v26  ;;  %v1379_v46 = vpop.eup %1378  ;;  %v1029_v47 = vrot.slane %v1856_v25, 4  ;;  %v1012_v49 = vadd.f32 %v1011_v55, %v1852_v0 }
 0x198   : > { %1404 = vtanh.f32 %v873_v12  ;;  %v874_v41 = vadd.f32 %v1839_v60, %v834_v10  ;;  %v1038_v60 = vrot.slane %v1858_v27, 4  ;;  %v916_v53 = vmul.f32 %v1379_v46, %v1836_v59 }
 0x199   : > { %v1381_v51 = vpop.eup %1380  ;;  %1406 = vtanh.f32 %v872_v40  ;;  %v1021_v58 = vadd.f32 %v1020_v3, %v1854_v24  ;;  %v1030_v15 = vadd.f32 %v1029_v47, %v1856_v25  ;;  %v1013_v43 = vrot.slane %v1012_v49, 2 }
 0x19a   : > { %v1383_v19 = vpop.eup %1382  ;;  %1408 = vtanh.f32 %v874_v41  ;;  %v918_v32 = vmul.f32 %v1381_v51, %v1836_v59  ;;  %v1039_v8 = vadd.f32 %v1038_v60, %v1858_v27  ;;  %v914_v16 = vpop.permute.xlu0 %913 }
 0x19b   : > { %v1385_v48 = vpop.eup %1384  ;;  %v917_v18 = vmul.f32 %v1383_v19, %v1836_v59  ;;  %v1022_v54 = vrot.slane %v1021_v58, 2  ;;  %v1031_v29 = vrot.slane %v1030_v15, 2 }
 0x19c   : > { %v1387_v50 = vpop.eup %1386  ;;  %v919_v44 = vmul.f32 %v1385_v48, %v1836_v59  ;;  %v1040_v10 = vrot.slane %v1039_v8, 2 }
 0x19d   : > { %v1389_v20 = vpop.eup %1388  ;;  %v920_v6 = vmul.f32 %v1387_v50, %v1843_v61  ;;  %v1085_v50 = vpop.permute.xlu1 %1084  ;;  %v1023_v55 = vadd.f32 %v1022_v54, %v1021_v58 }
 0x19e   : > { %v1391_v11 = vpop.eup %1390  ;;  %v922_v23 = vmul.f32 %v1389_v20, %v1843_v61  ;;  %v1014_v20 = vadd.f32 %v1013_v43, %v1012_v49  ;;  %v1051_v47 = vpop.permute.xlu0 %1050 }
 0x19f   : > { %v1393_v22 = vpop.eup %1392  ;;  %v921_v21 = vmul.f32 %v1391_v11, %v1843_v61  ;;  %v932_v42 = vadd.f32 %v920_v6, %v916_v53  ;;  %v1056_v60 = vrot.slane %v1051_v47, %v1691_v34  ;;  %v1090_v53 = vrot.slane %v1085_v50, %v1691_v34 }
 0x1a0   : > { %v1395_v13 = vpop.eup %1394  ;;  %v923_v2 = vmul.f32 %v1393_v22, %v1843_v61  ;;  %v950_v52 = vadd.f32 %v922_v23, %v918_v32  ;;  %v1041_v22 = vadd.f32 %v1040_v10, %v1039_v8  ;;  %v1024_v32 = vrot.slane %v1023_v55, 1 }
 0x1a1   : > { %v1397_v5 = vpop.eup %1396  ;;  %v924_v7 = vmul.f32 %v1395_v13, %v909_v57  ;;  %v941_v45 = vadd.f32 %v921_v21, %v917_v18  ;;  %v1057_v18 = vmul.f32 %v1056_v60, %v1704_v39 }
 0x1a2   : > { %v1399_v14 = vpop.eup %1398  ;;  %v926_v4 = vmul.f32 %v1397_v5, %v909_v57  ;;  %v959_v25 = vadd.f32 %v923_v2, %v919_v44 }
 0x1a3   : > { %v1401_v28 = vpop.eup %1400  ;;  %v925_v0 = vmul.f32 %v1399_v14, %v909_v57  ;;  %v933_v61 = vadd.f32 %v932_v42, %v924_v7  ;;  %v1015_v14 = vrot.slane %v1014_v20, 1 }
 0x1a4   : > { %v1403_v9 = vpop.eup %1402  ;;  %v927_v24 = vmul.f32 %v1401_v28, %v909_v57  ;;  %v951_v63 = vadd.f32 %v950_v52, %v926_v4  ;;  %v1032_v57 = vadd.f32 %v1031_v29, %v1030_v15  ;;  %v1042_v4 = vrot.slane %v1041_v22, 1 }
 0x1a5   : > { %v1405_v62 = vpop.eup %1404  ;;  %v928_v56 = vmul.f32 %v1403_v9, %v914_v16  ;;  %v942_v26 = vadd.f32 %v941_v45, %v925_v0  ;;  %v1091_v9 = vmul.f32 %v1702_v38, %v1090_v53  ;;  %v1016_v44 = vadd.f32 %v1015_v14, %v1014_v20 }
 0x1a6   : > { %v1407_v17 = vpop.eup %1406  ;;  %v930_v33 = vmul.f32 %v1405_v62, %v914_v16  ;;  %v960_v40 = vadd.f32 %v959_v25, %v927_v24  ;;  %v1033_v58 = vrot.slane %v1032_v57, 1  ;;  %v1025_v52 = vadd.f32 %v1024_v32, %v1023_v55 }
 0x1a7   : > { %v1409_v1 = vpop.eup %1408  ;;  %v934_v12 = vadd.f32 %v933_v61, %v928_v56  ;;  %v929_v27 = vmul.f32 %v1407_v17, %v914_v16  ;;  %v1043_v45 = vadd.f32 %v1042_v4, %v1041_v22  ;;  %v1062_v17 = vrot.slane %v1057_v18, %v1691_v34 }
 0x1a8   : > { %v952_v59 = vadd.f32 %v951_v63, %v930_v33  ;;  %v931_v46 = vmul.f32 %v1409_v1, %v914_v16  ;;  %v1034_v43 = vadd.f32 %v1033_v58, %v1032_v57  ;;  %v1096_v39 = vrot.slane %v1091_v9, %v1691_v34  ;;  %v1121_v33 = vpop.permute.xlu0 %1120 }
 0x1a9   : > { %v935_v41 = vrot.slane %v934_v12, 4  ;;  %v943_v51 = vadd.f32 %v942_v26, %v929_v27  ;;  %v1070_v63 = vrot.slane %v1057_v18, %v1697_v36  ;;  %v1104_v29 = vrot.slane %v1091_v9, %v1697_v36 }
 0x1aa   : > { %v953_v19 = vrot.slane %v952_v59, 4  ;;  %v961_v48 = vadd.f32 %v960_v40, %v931_v46  ;;  %v1066_v26 = vrot.slane %v1057_v18, %v1694_v35  ;;  %v1100_v10 = vrot.slane %v1091_v9, %v1694_v35 }
 0x1ab   : > { %v944_v11 = vrot.slane %v943_v51, 4  ;;  %v936_v3 = vadd.f32 %v935_v41, %v934_v12  ;;  %v1074_v40 = vrot.slane %v1057_v18, %v1700_v37  ;;  %v1108_v41 = vrot.slane %v1091_v9, %v1700_v37 }
 0x1ac   : > { %v962_v6 = vrot.slane %v961_v48, 4  ;;  %v954_v13 = vadd.f32 %v953_v19, %v952_v59  ;;  %v1491_v14 = vmov 1966171168  }
 0x1ad   : > { %v937_v23 = vrot.slane %v936_v3, 2  ;;  %v945_v5 = vadd.f32 %v944_v11, %v943_v51  ;;  %v1126_v51 = vrot.slane %v1121_v33, %v1691_v34  ;;  %v1162_v32 = vunpack.c.l.s4 %v1491_v14 }
 0x1ae   : > { %v955_v21 = vrot.slane %v954_v13, 2  ;;  %v963_v7 = vadd.f32 %v962_v6, %v961_v48 }
 0x1af   : > { %v938_v2 = vadd.f32 %v937_v23, %v936_v3  ;;  %v946_v49 = vrot.slane %v945_v5, 2 }
 0x1b0   : > { %v956_v28 = vadd.f32 %v955_v21, %v954_v13  ;;  %v964_v15 = vrot.slane %v963_v7, 2 }
 0x1b1   : > { %v939_v42 = vrot.slane %v938_v2, 1  ;;  %v947_v0 = vadd.f32 %v946_v49, %v945_v5 }
 0x1b2   : > { %v957_v8 = vrot.slane %v956_v28, 1  ;;  %v965_v16 = vadd.f32 %v964_v15, %v963_v7 }
 0x1b3   : > { %v940_v24 = vadd.f32 %v939_v42, %v938_v2  ;;  %v948_v62 = vrot.slane %v947_v0, 1  ;;  %v1163_v2 = vunpack.c.0.s8 %v1162_v32 }
 0x1b4   : > { %v958_v61 = vadd.f32 %v957_v8, %v956_v28  ;;  %v966_v56 = vrot.slane %v965_v16, 1 }
 0x1b5   : > { %v949_v54 = vadd.f32 %v948_v62, %v947_v0  ;;  %v1044_v25 = vadd.f32 %v1016_v44, %v940_v24  ;;  %v1166_v4 = vsub.s32 %v1163_v2, %v1685_v31 }
 0x1b6   : > { %v967_v38 = vadd.f32 %v966_v56, %v965_v16  ;;  %v1046_v1 = vadd.f32 %v1034_v43, %v958_v61 }
 0x1b7   : > { %v1045_v12 = vadd.f32 %v1025_v52, %v949_v54  ;;  %v1079_v27 = vadd.f32 %v1062_v17, %v1044_v25 }
 0x1b8   : > { %v1047_v59 = vadd.f32 %v1043_v45, %v967_v38  ;;  %v1081_v46 = vadd.f32 %v1070_v63, %v1046_v1 }
 0x1b9   : > { %v1080_v19 = vadd.f32 %v1066_v26, %v1045_v12  ;;  %v1113_v48 = vadd.f32 %v1096_v39, %v1079_v27 }
 0x1ba   : > { %v1082_v50 = vadd.f32 %v1074_v40, %v1047_v59  ;;  %v1115_v20 = vadd.f32 %v1104_v29, %v1081_v46 }
 0x1bb   : > { %v1114_v55 = vadd.f32 %v1100_v10, %v1080_v19  ;;  %v1127_v36 = vadd.f32 %v1126_v51, %v1113_v48 }
 0x1bc   : > { %v1116_v11 = vadd.f32 %v1108_v41, %v1082_v50  ;;  %v1129_v3 = vadd.f32 %v1126_v51, %v1115_v20 }
 0x1bd   : > { %v1128_v57 = vadd.f32 %v1126_v51, %v1114_v55  ;;  %v1279_v22 = vmul.f32 -1.442695, %v1127_v36 }
 0x1be   : > { %v1130_v47 = vadd.f32 %v1126_v51, %v1116_v11  ;;  %v1281_v35 = vmul.f32 -1.442695, %v1129_v3 }
 0x1bf   : > { %1410 = vpow2.f32 %v1279_v22  ;;  %v1280_v6 = vmul.f32 -1.442695, %v1128_v57 }
 0x1c0   : > { %1412 = vpow2.f32 %v1281_v35  ;;  %v1282_v13 = vmul.f32 -1.442695, %v1130_v47 }
 0x1c1   : > { %1414 = vpow2.f32 %v1280_v6 }
 0x1c2   : > { %1416 = vpow2.f32 %v1282_v13 }
 0x1cc   : > { %v1411_v34 = vpop.eup %1410 }
 0x1cd   : > { %v1413_v37 = vpop.eup %1412  ;;  %v1143_v60 = vadd.f32 1.0, %v1411_v34 }
 0x1ce   : > { %v1415_v23 = vpop.eup %1414  ;;  %v1145_v5 = vadd.f32 1.0, %v1413_v37 }
 0x1cf   : > { %v1417_v53 = vpop.eup %1416  ;;  %v1144_v21 = vadd.f32 1.0, %v1415_v23  ;;  %1418 = vrcp.f32 %v1143_v60 }
 0x1d0   : > { %v1146_v7 = vadd.f32 1.0, %v1417_v53  ;;  %1420 = vrcp.f32 %v1145_v5 }
 0x1d1   : > { %1422 = vrcp.f32 %v1144_v21 }
 0x1d2   : > { %1424 = vrcp.f32 %v1146_v7 }
 0x1dc   : > { %v1419_v49 = vpop.eup %1418 }
 0x1dd   : > { %v1421_v58 = vpop.eup %1420 }
 0x1de   : > { %v1423_v28 = vpop.eup %1422 }
 0x1df   : > { %v1425_v15 = vpop.eup %1424  ;;  %v1159_v18 = vcombine.low %v1419_v49, %v1423_v28 }
 0x1e0   : > { %v1160_v42 = vcombine.low %v1421_v58, %v1425_v15 }
 0x1e1   : > { %v1167_v0 = vrot.slane %v1159_v18, %v1166_v4 }
 0x1e2   : > { %v1174_v9 = vrot.slane %v1160_v42, %v1166_v4 }
 0x1e4   : > { %v1175_v8 = vcombine.low %v1167_v0, %v1174_v9 }
 0x1e6   : > { %v1182_v16 = vrot.slane %v1175_v8, %v1166_v4 }
 0x1e8   : > { %1188 = vst.msk [vmem:[%s355_s12] sm:$0xf] %vm1186_vm1, %v1182_v16 }
 0x1e9   : > { %1439 = shalt.err (!%p1436_p3)
}
 0x1ea   : > { %s1440_s30 = scalar_lea.hbm %s1202_s21, 64  ;;  %s1444_s12 = scalar_lea.hbm %s2036_s10, 128 }
 0x1eb   : > { %p1441_p4 = scmp.ne.s32.totalorder %s1202_s21, %s1440_s30  ;;  %p1445_p9 = scmp.lt.s32.totalorder %s1202_s21, %s2036_s10 }
 0x1ec   : > { %p1446_p10 = scmp.lt.s32.totalorder %s1444_s12, %s1440_s30 }
 0x1ed   : > { %p1442_p7 = pnand %p1441_p4, %p1589_p5 }
 0x1ee   : > { %p1447_p11 = por %p1446_p10, %p1445_p9 }
 0x1ef   : > { %p1443_p8 = pneg %p1442_p7 }
 0x1f1   : > { %p1448_p12 = pnand %p1447_p11, %p1443_p8 }
 0x1f3   : > { %1451 = shalt.err (!%p1448_p12)
}
 0x1f4   : > { %1289 = dma.vmem_to_hbm [thread:$0]  (%p1589_p5), %s1205_s13, 64, %s1202_s21, %s1190_s22  }
 0x1f5 PF: > { %p1295_p13 = scmp.ge.s32.totalorder %s1486_s18, 2  ;;  %s1216_s26 = sand.u32 1, %s1474_s15  }
 0x1f6   : > { %s1217_s27 = scalar_lea.sflag [#allocation4], %s1216_s26 }
 0x1f7   : > { %p1292_p0 = pnand %p1295_p13, %p1593_p6 }
 0x1f9   : > { %p1293_p1 = pneg %p1292_p0 }
 0x1fb   : > { %1469 = dma.done.wait (%p1293_p1), %s1217_s27, 64  }
 0x1fc   : > { %1471 = vsyncadd (%p1293_p1), %s1217_s27, 4294967232  ;;  %p22_p2 = scmp.ge.s32.totalorder %s1576_s20, 4   ;;  %s2039_s15 = smov %s1478_s16 }
 0x1fd   : > { %s2040_s16 = smov %s1482_s17  ;;  %s2041_s17 = smov %s1587_s23 }
 0x1fe   : > { %s2042_s18 = smov %s1576_s20  ;;  %24 = sbr.rel (!%p22_p2) target bundleno = 6 (0x6), region = 96 }
 0x203   :  { %1222 = vsyncpa [#allocation4], 1 }
 0x204   :  { %1224 = vsyncpa [#allocation4 + $0x1], 1 }

</bundles_post_ra>
